<compile_context>
chip_gen: v5e
topology: v5e:2x2
jax: 0.10.0
libtpu: 0.0.40
codegen_flags: <defaults>
</compile_context>

<pallas_src>
import jax
import jax.numpy as jnp
from jax import lax
from jax.experimental import pallas as pl
from jax.experimental.pallas import tpu as pltpu


def _dqn_kernel(x_ref, w1_ref, b1_ref, w2_ref, b2_ref, o_ref):
    # Hidden layer: x @ W1^T (contract x dim 1 with w1 dim 1 — MXU handles the
    # transposed RHS natively; no transpose op emitted in the kernel body),
    # f32 accumulation on the MXU, bias + ReLU on the VPU.
    h = lax.dot_general(
        x_ref[...], w1_ref[...],
        dimension_numbers=(((1,), (1,)), ((), ())),
        preferred_element_type=jnp.float32,
    )
    h = jnp.maximum(h + b1_ref[...], 0.0)          # (TM, H) + (1, H) broadcast

    # Output layer: h @ W2^T + b2
    out = lax.dot_general(
        h, w2_ref[...],
        dimension_numbers=(((1,), (1,)), ((), ())),
        preferred_element_type=jnp.float32,
    )
    o_ref[...] = (out + b2_ref[...]).astype(o_ref.dtype)


def _default_num_cores():
    """2 TensorCores per chip on v7x, 1 on v5e/v6e (best effort detection)."""
    try:
        kind = jax.devices()[0].device_kind.lower()
        return 2 if ("v7" in kind or "tpu7" in kind) else 1
    except Exception:  # pragma: no cover - conservative fallback
        return 1


def _pick_batch_tile(B, tm, num_cores):
    """Pick (TM, B_pad): large tiles, 8-row aligned, preferring TM | B (no pad)."""
    n_tiles = max(num_cores, pl.cdiv(B, tm))
    if n_tiles == 1:
        # Single tile: block equals the full array dim (legal even if B % 8 != 0).
        return B, B
    TM = pl.cdiv(B, n_tiles)
    TM = max(8, ((TM + 7) // 8) * 8)               # sublane (8-row) aligned
    if B % TM != 0:
        # Prefer a divisor of B (>= TM/2, multiple of 8) -> no pad/slice copies.
        div = next((c for c in range(TM, max(TM // 2, 8) - 1, -8) if B % c == 0),
                   None)
        if div is not None:
            TM = div
    B_pad = pl.cdiv(B, TM) * TM
    return TM, B_pad


def linear_dqn_forward(x, w1, b1, w2, b2, *, tm=512, num_cores=None):
    """Forward pass of Linear_DQN.

    x : (B, in_features)            activations
    w1: (hidden, in_features)       nn.Linear layout (NOT transposed)
    b1: (hidden,)
    w2: (out_features, hidden)      nn.Linear layout (NOT transposed)
    b2: (out_features,)
    tm: max batch tile (512 = knee of the measured tile-size sweep)
    num_cores: force >= this many batch tiles (2 on v7x for megacore sharding);
               auto-detected when None.
    """
    B, in_f = x.shape
    hidden = w1.shape[0]
    out_f = w2.shape[0]

    if num_cores is None:
        num_cores = _default_num_cores()

    # Metadata-only lifts of the biases to 2D rows (free; no transposes emitted).
    b1_r = b1.reshape(1, hidden)
    b2_r = b2.reshape(1, out_f)

    TM, B_pad = _pick_batch_tile(B, tm, num_cores)
    # Pad only as a rare fallback (TM usually divides B — no HBM copies).
    x_p = x if B_pad == B else jnp.pad(x, ((0, B_pad - B), (0, 0)))
    grid = (B_pad // TM,)

    out = pl.pallas_call(
        _dqn_kernel,
        out_shape=jax.ShapeDtypeStruct((B_pad, out_f), x.dtype),
        grid=grid,
        in_specs=[
            pl.BlockSpec((TM, in_f), lambda i: (i, 0)),        # x: tiled over batch
            pl.BlockSpec((hidden, in_f), lambda i: (0, 0)),    # W1: VMEM-resident
            pl.BlockSpec((1, hidden), lambda i: (0, 0)),       # b1: VMEM-resident
            pl.BlockSpec((out_f, hidden), lambda i: (0, 0)),   # W2: VMEM-resident
            pl.BlockSpec((1, out_f), lambda i: (0, 0)),        # b2: VMEM-resident
        ],
        out_specs=pl.BlockSpec((TM, out_f), lambda i: (i, 0)),
        compiler_params=pltpu.CompilerParams(
            dimension_semantics=("parallel",),                 # megacore-shardable
        ),
    )(x_p, w1, b1_r, w2, b2_r)

    return out if B_pad == B else out[:B]


def init_linear_params(key, in_features, out_features):
    """Deterministic init matching nn.Linear's U(-1/sqrt(fan_in), 1/sqrt(fan_in))."""
    kw, kb = jax.random.split(key)
    bound = 1.0 / (in_features ** 0.5)
    w = jax.random.uniform(kw, (out_features, in_features), jnp.float32, -bound, bound)
    b = jax.random.uniform(kb, (out_features,), jnp.float32, -bound, bound)
    return w, b


if __name__ == "__main__":
    # Linear_DQN(input_size=(16,), hidden_size=32, output_size=4, lr=...)
    # Replay batch of 1024 stacked samples: with tm=512 this is two grid steps
    # (no pad, no slice), and the parallel batch axis spans both TCs on v7x.
    batch, input_size, hidden_size, output_size = 1024, 16, 32, 4

    key = jax.random.PRNGKey(0)
    kx, k1, k2 = jax.random.split(key, 3)

    x = jax.random.normal(kx, (batch, input_size), jnp.float32)
    w1, b1 = init_linear_params(k1, input_size, hidden_size)
    w2, b2 = init_linear_params(k2, hidden_size, output_size)

    fwd = jax.jit(linear_dqn_forward)
    actions = fwd(x, w1, b1, w2, b2)
    actions = jax.block_until_ready(actions)

    # Reference check in plain JAX (same math as the PyTorch forward).
    ref = jnp.maximum(x @ w1.T + b1, 0.0) @ w2.T + b2
    assert actions.shape == (batch, output_size)
    assert jnp.allclose(actions, ref, atol=1e-5, rtol=1e-5)

    print("KERNEL_OK")
</pallas_src>

<mosaic_0001>
module attributes {stable_mosaic.version = 11 : i64} {
  func.func @_dqn_kernel(%arg0: i32, %arg1: memref<512x16xf32, #tpu.memory_space<vmem>>, %arg2: memref<32x16xf32, #tpu.memory_space<vmem>>, %arg3: memref<1x32xf32, #tpu.memory_space<vmem>>, %arg4: memref<4x32xf32, #tpu.memory_space<vmem>>, %arg5: memref<1x4xf32, #tpu.memory_space<vmem>>, %arg6: memref<512x4xf32, #tpu.memory_space<vmem>>) attributes {dimension_semantics = [#tpu.dimension_semantics<parallel>], iteration_bounds = array<i64: 2>, scalar_prefetch = 0 : i64, scratch_operands = 0 : i64, tpu.core_type = #tpu.core_type<tc>, window_params = [{transform_indices = @transform_0, window_bounds = array<i64: 512, 16>}, {pipeline_mode = #tpu.pipeline_mode<synchronous>, transform_indices = @transform_1, window_bounds = array<i64: 32, 16>}, {pipeline_mode = #tpu.pipeline_mode<synchronous>, transform_indices = @transform_2, window_bounds = array<i64: 1, 32>}, {pipeline_mode = #tpu.pipeline_mode<synchronous>, transform_indices = @transform_3, window_bounds = array<i64: 4, 32>}, {pipeline_mode = #tpu.pipeline_mode<synchronous>, transform_indices = @transform_4, window_bounds = array<i64: 1, 4>}, {transform_indices = @transform_5, window_bounds = array<i64: 512, 4>}]} {
    %c0 = arith.constant 0 : index
    %c0_0 = arith.constant 0 : index
    %0 = vector.load %arg1[%c0, %c0_0] : memref<512x16xf32, #tpu.memory_space<vmem>>, vector<512x16xf32>
    %c0_1 = arith.constant 0 : index
    %c0_2 = arith.constant 0 : index
    %1 = vector.load %arg2[%c0_1, %c0_2] : memref<32x16xf32, #tpu.memory_space<vmem>>, vector<32x16xf32>
    %cst = arith.constant dense<0.000000e+00> : vector<512x32xf32>
    %2 = tpu.matmul %0, %1, %cst {dimension_numbers = #tpu.dot_dimension_numbers<[1], [1], [0], [0], [0, 0, 1, 0], [], []>} : vector<512x16xf32>, vector<32x16xf32>, vector<512x32xf32> -> vector<512x32xf32>
    %c0_3 = arith.constant 0 : index
    %c0_4 = arith.constant 0 : index
    %3 = vector.load %arg3[%c0_3, %c0_4] : memref<1x32xf32, #tpu.memory_space<vmem>>, vector<1x32xf32>
    %4 = vector.broadcast %3 : vector<1x32xf32> to vector<512x32xf32>
    %5 = arith.addf %2, %4 : vector<512x32xf32>
    %cst_5 = arith.constant 0.000000e+00 : f32
    %6 = vector.broadcast %cst_5 : f32 to vector<512x32xf32>
    %7 = arith.maximumf %5, %6 : vector<512x32xf32>
    %c0_6 = arith.constant 0 : index
    %c0_7 = arith.constant 0 : index
    %8 = vector.load %arg4[%c0_6, %c0_7] : memref<4x32xf32, #tpu.memory_space<vmem>>, vector<4x32xf32>
    %cst_8 = arith.constant dense<0.000000e+00> : vector<512x4xf32>
    %9 = tpu.matmul %7, %8, %cst_8 {dimension_numbers = #tpu.dot_dimension_numbers<[1], [1], [0], [0], [0, 0, 1, 0], [], []>} : vector<512x32xf32>, vector<4x32xf32>, vector<512x4xf32> -> vector<512x4xf32>
    %c0_9 = arith.constant 0 : index
    %c0_10 = arith.constant 0 : index
    %10 = vector.load %arg5[%c0_9, %c0_10] : memref<1x4xf32, #tpu.memory_space<vmem>>, vector<1x4xf32>
    %11 = vector.broadcast %10 : vector<1x4xf32> to vector<512x4xf32>
    %12 = arith.addf %9, %11 : vector<512x4xf32>
    %c0_11 = arith.constant 0 : index
    %c0_12 = arith.constant 0 : index
    %13 = vector.load %arg6[%c0_11, %c0_12] : memref<512x4xf32, #tpu.memory_space<vmem>>, vector<512x4xf32>
    tpu.vector_store %arg6[%c0_11, %c0_12], %12 {strides = array<i32>} : memref<512x4xf32, #tpu.memory_space<vmem>>, vector<512x4xf32>,
    return
  }
  func.func @transform_0(%arg0: i32) -> (i32, i32) {
    %c0_i32 = arith.constant 0 : i32
    %c0_i32_0 = arith.constant 0 : i32
    return %arg0, %c0_i32 : i32, i32
  }
  func.func @transform_1(%arg0: i32) -> (i32, i32) {
    %c0_i32 = arith.constant 0 : i32
    %c0_i32_0 = arith.constant 0 : i32
    %c0_i32_1 = arith.constant 0 : i32
    return %c0_i32, %c0_i32_0 : i32, i32
  }
  func.func @transform_2(%arg0: i32) -> (i32, i32) {
    %c0_i32 = arith.constant 0 : i32
    %c0_i32_0 = arith.constant 0 : i32
    %c0_i32_1 = arith.constant 0 : i32
    return %c0_i32, %c0_i32_0 : i32, i32
  }
  func.func @transform_3(%arg0: i32) -> (i32, i32) {
    %c0_i32 = arith.constant 0 : i32
    %c0_i32_0 = arith.constant 0 : i32
    %c0_i32_1 = arith.constant 0 : i32
    return %c0_i32, %c0_i32_0 : i32, i32
  }
  func.func @transform_4(%arg0: i32) -> (i32, i32) {
    %c0_i32 = arith.constant 0 : i32
    %c0_i32_0 = arith.constant 0 : i32
    %c0_i32_1 = arith.constant 0 : i32
    return %c0_i32, %c0_i32_0 : i32, i32
  }
  func.func @transform_5(%arg0: i32) -> (i32, i32) {
    %c0_i32 = arith.constant 0 : i32
    %c0_i32_0 = arith.constant 0 : i32
    return %arg0, %c0_i32 : i32, i32
  }
}

</mosaic_0001>

<bundles_post_ra>
// kernel: linear_dqn_forward.1
= control target key start
LH: loop header
LB: loop body
LE: loop exit
PB: predicated region body
PF: predicated region fallthrough
CT: control target
= control target key end

     0   :  { %s1506_s18 = smov 0   ;;  %s2020_s0 = inlined_call_operand.vmem [shape: f32[1024,16], index: 0, kind: input, shape index: {}]   ;;  %s2021_s1 = inlined_call_operand.vmem [shape: f32[32,16], index: 1, kind: input, shape index: {}]   ;;  %s2022_s2 = inlined_call_operand.vmem [shape: f32[1,32], index: 2, kind: input, shape index: {}]   ;;  %s2023_s3 = inlined_call_operand.vmem [shape: f32[4,32], index: 3, kind: input, shape index: {}]   ;;  %s2024_s4 = inlined_call_operand.vmem [shape: f32[1,4], index: 4, kind: input, shape index: {}]   ;;  %s2025_s5 = inlined_call_operand.vmem [shape: f32[1024,4], index: 5, kind: output, shape index: {}]  }
   0x1 LB: > { %s1309_s19 = sadd.s32 4294967295, %s1474_s18   ;;  %p1313_p0 = scmp.ge.s32.totalorder %s1474_s18, 1  ;;  %s1474_s18 = sphi %s1506_s18, %s15_s18  }
   0x2   : > { %p188_p1 = scmp.lt.s32.totalorder %s1474_s18, 3 }
   0x4   : > { %p189_p2 = pnand %p1313_p0, %p188_p1 }
   0x5   : > { %s1314_s22 = sshll.u32 (!%p189_p2), %s1309_s19, 6 }
   0x6   : > { %192 = sbr.rel (%p189_p2) target bundleno = 547 (0x223), region = 40  ;;  %p217_p3 = scmp.lt.s32.totalorder (!%p189_p2), %s1314_s22, 127 }
   0xb   : > { %v295_v0 = vld [vmem:[%s2021_s1 + $0x18] sm:$0xff]  ;;  %vm300_vm0 = vcmask 130048   ;;  %v294_v1 = vld [vmem:[%s2021_s1 + $0x10] sm:$0xff]  ;;  %s2027_s22 = smov (!%p217_p3, %s1314_s22), 127  ;;  %v293_v2 = vld [vmem:[%s2021_s1 + $0x8] sm:$0xff]  ;;  %vm783_vm1 = vcmask 261120  }
   0xc   : > { %1318 = vmatpush.xpose.msk.msra.mxu0 %vm300_vm0, %v295_v0  ;;  %1453 = vmatpush.xpose.msk.msra.mxu2 %vm300_vm0, %v295_v0  ;;  %s1315_s27 = sshll.u32 %s2027_s22, 3  ;;  %v292_v3 = vld [vmem:[%s2021_s1] sm:$0xff]  ;;  %vm1188_vm2 = vcmask 31744  }
   0xd   : > { %s1540_s7 = scalar_lea.vmem %s2020_s0, %s1315_s27  ;;  %v778_v30 = vld [vmem:[%s2023_s3] sm:$0xf]  ;;  %s1756_s16 = scalar_lea.vmem %s2025_s5, %s1315_s27 }
   0xe   : > { %v228_v4 = vld [vmem:[%s1540_s7] sm:$0xff]  ;;  %v229_v6 = vld [vmem:[%s1540_s7 + $0x8] sm:$0xff]  ;;  %v230_v8 = vld [vmem:[%s1540_s7 + $0x10] sm:$0xff]  ;;  %1386 = vmatpush.xpose.msk.msra.mxu1 %vm783_vm1, %v778_v30  ;;  %1457 = vmatpush.xpose.msk.msra.mxu3 %vm783_vm1, %v778_v30 }
   0xf   : > { %v260_v5 = vld [vmem:[%s1540_s7 + $0x100] sm:$0xff]  ;;  %v261_v7 = vld [vmem:[%s1540_s7 + $0x108] sm:$0xff]  ;;  %v262_v9 = vld [vmem:[%s1540_s7 + $0x110] sm:$0xff] }
  0x10   : > { %1319 = vmatpush.xpose.msk.msra.mxu0 %vm300_vm0, %v294_v1  ;;  %1454 = vmatpush.xpose.msk.msra.mxu2 %vm300_vm0, %v294_v1  ;;  %v231_v10 = vld [vmem:[%s1540_s7 + $0x18] sm:$0xff]  ;;  %v232_v12 = vld [vmem:[%s1540_s7 + $0x20] sm:$0xff]  ;;  %v233_v14 = vld [vmem:[%s1540_s7 + $0x28] sm:$0xff] }
  0x11   : > { %v263_v11 = vld [vmem:[%s1540_s7 + $0x118] sm:$0xff]  ;;  %v264_v13 = vld [vmem:[%s1540_s7 + $0x120] sm:$0xff]  ;;  %v265_v15 = vld [vmem:[%s1540_s7 + $0x128] sm:$0xff] }
  0x12   : > { %v234_v16 = vld [vmem:[%s1540_s7 + $0x30] sm:$0xff]  ;;  %v235_v18 = vld [vmem:[%s1540_s7 + $0x38] sm:$0xff]  ;;  %v236_v20 = vld [vmem:[%s1540_s7 + $0x40] sm:$0xff] }
  0x13   : > { %v266_v17 = vld [vmem:[%s1540_s7 + $0x130] sm:$0xff]  ;;  %v267_v19 = vld [vmem:[%s1540_s7 + $0x138] sm:$0xff]  ;;  %v268_v21 = vld [vmem:[%s1540_s7 + $0x140] sm:$0xff] }
  0x14   : > { %1320 = vmatpush.xpose.msk.msra.mxu0 %vm300_vm0, %v293_v2  ;;  %1455 = vmatpush.xpose.msk.msra.mxu2 %vm300_vm0, %v293_v2  ;;  %v237_v22 = vld [vmem:[%s1540_s7 + $0x48] sm:$0xff]  ;;  %v238_v24 = vld [vmem:[%s1540_s7 + $0x50] sm:$0xff]  ;;  %v239_v26 = vld [vmem:[%s1540_s7 + $0x58] sm:$0xff] }
  0x15   : > { %v269_v23 = vld [vmem:[%s1540_s7 + $0x148] sm:$0xff]  ;;  %v270_v25 = vld [vmem:[%s1540_s7 + $0x150] sm:$0xff]  ;;  %v271_v27 = vld [vmem:[%s1540_s7 + $0x158] sm:$0xff] }
  0x16   : > { %v240_v28 = vld [vmem:[%s1540_s7 + $0x60] sm:$0xff]  ;;  %v241_v31 = vld [vmem:[%s1540_s7 + $0x68] sm:$0xff]  ;;  %v242_v33 = vld [vmem:[%s1540_s7 + $0x70] sm:$0xff] }
  0x17   : > { %v272_v29 = vld [vmem:[%s1540_s7 + $0x160] sm:$0xff]  ;;  %v273_v32 = vld [vmem:[%s1540_s7 + $0x168] sm:$0xff]  ;;  %v274_v34 = vld [vmem:[%s1540_s7 + $0x170] sm:$0xff] }
  0x18   : > { %1321 = vmatpush.xpose.msk.msra.mxu0 %vm300_vm0, %v292_v3  ;;  %1456 = vmatpush.xpose.msk.msra.mxu2 %vm300_vm0, %v292_v3  ;;  %v243_v35 = vld [vmem:[%s1540_s7 + $0x78] sm:$0xff]  ;;  %v1616_v37 = vld [vmem:[%s2022_s2] ss:$0 sm:$0xff]  ;;  %v245_v45 = vld [vmem:[%s1540_s7 + $0x88] sm:$0xff] }
  0x19   : > { %v275_v36 = vld [vmem:[%s1540_s7 + $0x178] sm:$0xff]  ;;  %v244_v39 = vld [vmem:[%s1540_s7 + $0x80] sm:$0xff]  ;;  %v277_v46 = vld [vmem:[%s1540_s7 + $0x188] sm:$0xff] }
  0x1a   : > { %v276_v40 = vld [vmem:[%s1540_s7 + $0x180] sm:$0xff]  ;;  %v246_v52 = vld [vmem:[%s1540_s7 + $0x90] sm:$0xff]  ;;  %v247_v60 = vld [vmem:[%s1540_s7 + $0x98] sm:$0xff] }
  0x1b   : > { %1322 = vmatmul.msk.f32.vlgmr.msra.gmra.mxu0 %vm300_vm0, %v228_v4  ;;  %1354 = vmatmul.msk.f32.vlgmr.msra.gmra.mxu2 %vm300_vm0, %v260_v5  ;;  %v278_v53 = vld [vmem:[%s1540_s7 + $0x190] sm:$0xff]  ;;  %v279_v61 = vld [vmem:[%s1540_s7 + $0x198] sm:$0xff]  ;;  %v248_v4 = vld [vmem:[%s1540_s7 + $0xa0] sm:$0xff] }
  0x1c   : > { %v280_v5 = vld [vmem:[%s1540_s7 + $0x1a0] sm:$0xff] }
  0x23   : > { %1323 = vmatmul.msk.f32.gmra.mxu0 %vm300_vm0, %v229_v6  ;;  %1355 = vmatmul.msk.f32.gmra.mxu2 %vm300_vm0, %v261_v7 }
  0x2b   : > { %1324 = vmatmul.msk.f32.gmra.mxu0 %vm300_vm0, %v230_v8  ;;  %1356 = vmatmul.msk.f32.gmra.mxu2 %vm300_vm0, %v262_v9 }
  0x33   : > { %1325 = vmatmul.msk.f32.gmra.mxu0 %vm300_vm0, %v231_v10  ;;  %1357 = vmatmul.msk.f32.gmra.mxu2 %vm300_vm0, %v263_v11 }
  0x3b   : > { %1326 = vmatmul.msk.f32.gmra.mxu0 %vm300_vm0, %v232_v12  ;;  %1358 = vmatmul.msk.f32.gmra.mxu2 %vm300_vm0, %v264_v13  ;;  %v249_v12 = vld [vmem:[%s1540_s7 + $0xa8] sm:$0xff] }
  0x3c   : > { %v281_v13 = vld [vmem:[%s1540_s7 + $0x1a8] sm:$0xff] }
  0x43   : > { %1327 = vmatmul.msk.f32.gmra.mxu0 %vm300_vm0, %v233_v14  ;;  %1359 = vmatmul.msk.f32.gmra.mxu2 %vm300_vm0, %v265_v15 }
  0x4b   : > { %1328 = vmatmul.msk.f32.gmra.mxu0 %vm300_vm0, %v234_v16  ;;  %1360 = vmatmul.msk.f32.gmra.mxu2 %vm300_vm0, %v266_v17 }
  0x53   : > { %1329 = vmatmul.msk.f32.gmra.mxu0 %vm300_vm0, %v235_v18  ;;  %1361 = vmatmul.msk.f32.gmra.mxu2 %vm300_vm0, %v267_v19 }
  0x5b   : > { %1330 = vmatmul.msk.f32.gmra.mxu0 %vm300_vm0, %v236_v20  ;;  %1362 = vmatmul.msk.f32.gmra.mxu2 %vm300_vm0, %v268_v21  ;;  %v250_v20 = vld [vmem:[%s1540_s7 + $0xb0] sm:$0xff] }
  0x5c   : > { %v282_v21 = vld [vmem:[%s1540_s7 + $0x1b0] sm:$0xff] }
  0x63   : > { %1331 = vmatmul.msk.f32.gmra.mxu0 %vm300_vm0, %v237_v22  ;;  %1363 = vmatmul.msk.f32.gmra.mxu2 %vm300_vm0, %v269_v23 }
  0x6b   : > { %1332 = vmatmul.msk.f32.gmra.mxu0 %vm300_vm0, %v238_v24  ;;  %1364 = vmatmul.msk.f32.gmra.mxu2 %vm300_vm0, %v270_v25 }
  0x73   : > { %1333 = vmatmul.msk.f32.gmra.mxu0 %vm300_vm0, %v239_v26  ;;  %1365 = vmatmul.msk.f32.gmra.mxu2 %vm300_vm0, %v271_v27 }
  0x7b   : > { %1334 = vmatmul.msk.f32.gmra.mxu0 %vm300_vm0, %v240_v28  ;;  %1366 = vmatmul.msk.f32.gmra.mxu2 %vm300_vm0, %v272_v29  ;;  %v251_v28 = vld [vmem:[%s1540_s7 + $0xb8] sm:$0xff] }
  0x7c   : > { %v283_v29 = vld [vmem:[%s1540_s7 + $0x1b8] sm:$0xff] }
  0x83   : > { %1335 = vmatmul.msk.f32.gmra.mxu0 %vm300_vm0, %v241_v31  ;;  %1367 = vmatmul.msk.f32.gmra.mxu2 %vm300_vm0, %v273_v32 }
  0x8b   : > { %1336 = vmatmul.msk.f32.gmra.mxu0 %vm300_vm0, %v242_v33  ;;  %1368 = vmatmul.msk.f32.gmra.mxu2 %vm300_vm0, %v274_v34 }
  0x93   : > { %1337 = vmatmul.msk.f32.gmra.mxu0 %vm300_vm0, %v243_v35  ;;  %1369 = vmatmul.msk.f32.gmra.mxu2 %vm300_vm0, %v275_v36  ;;  %v252_v36 = vld [vmem:[%s1540_s7 + $0xc0] sm:$0xff] }
  0x98   : > { %v522_v38 = vpop.f32.mrf.mxu0 }
  0x99   : > { %v523_v41 = vadd.f32 %v1616_v37, %v522_v38  ;;  %v284_v38 = vld [vmem:[%s1540_s7 + $0x1c0] sm:$0xff] }
  0x9b   : > { %v714_v42 = vmax.f32 %v523_v41, 0.0  ;;  %1338 = vmatmul.msk.f32.gmra.mxu0 %vm300_vm0, %v244_v39  ;;  %1370 = vmatmul.msk.f32.gmra.mxu2 %vm300_vm0, %v276_v40 }
  0x9d   : > { %1387 = vmatmul.msk.f32.vlgmr.msra.gmra.mxu1 %vm783_vm1, %v714_v42 }
  0x9e   : > { %v1624_v43 = vpop.f32.mrf.mxu2 }
  0xa0   : > { %v525_v44 = vpop.f32.mrf.mxu0 }
  0xa1   : > { %v526_v47 = vadd.f32 %v1616_v37, %v525_v44 }
  0xa3   : > { %v715_v48 = vmax.f32 %v526_v47, 0.0  ;;  %1339 = vmatmul.msk.f32.gmra.mxu0 %vm300_vm0, %v245_v45  ;;  %1371 = vmatmul.msk.f32.gmra.mxu2 %vm300_vm0, %v277_v46  ;;  %v253_v46 = vld [vmem:[%s1540_s7 + $0xc8] sm:$0xff] }
  0xa4   : > { %v285_v47 = vld [vmem:[%s1540_s7 + $0x1c8] sm:$0xff] }
  0xa5   : > { %1388 = vmatmul.msk.f32.gmra.mxu1 %vm783_vm1, %v715_v48 }
  0xa6   : > { %v621_v49 = vpop.f32.mrf.mxu2 }
  0xa7   : > { %v622_v50 = vadd.f32 %v1616_v37, %v621_v49 }
  0xa8   : > { %v528_v51 = vpop.f32.mrf.mxu0 }
  0xa9   : > { %v747_v54 = vmax.f32 %v622_v50, 0.0  ;;  %v529_v55 = vadd.f32 %v1616_v37, %v528_v51 }
  0xab   : > { %v716_v56 = vmax.f32 %v529_v55, 0.0  ;;  %1340 = vmatmul.msk.f32.gmra.mxu0 %vm300_vm0, %v246_v52  ;;  %1372 = vmatmul.msk.f32.gmra.mxu2 %vm300_vm0, %v278_v53  ;;  %v286_v55 = vld [vmem:[%s1540_s7 + $0x1d0] sm:$0xff] }
  0xac   : > { %1420 = vmatmul.msk.f32.vlgmr.msra.gmra.mxu3 %vm783_vm1, %v747_v54  ;;  %v254_v54 = vld [vmem:[%s1540_s7 + $0xd0] sm:$0xff] }
  0xad   : > { %1389 = vmatmul.msk.f32.gmra.mxu1 %vm783_vm1, %v716_v56 }
  0xae   : > { %v624_v57 = vpop.f32.mrf.mxu2 }
  0xaf   : > { %v625_v58 = vadd.f32 %v1616_v37, %v624_v57 }
  0xb0   : > { %v531_v59 = vpop.f32.mrf.mxu0 }
  0xb1   : > { %v748_v62 = vmax.f32 %v625_v58, 0.0  ;;  %v532_v63 = vadd.f32 %v1616_v37, %v531_v59 }
  0xb3   : > { %v717_v0 = vmax.f32 %v532_v63, 0.0  ;;  %1341 = vmatmul.msk.f32.gmra.mxu0 %vm300_vm0, %v247_v60  ;;  %1373 = vmatmul.msk.f32.gmra.mxu2 %vm300_vm0, %v279_v61  ;;  %v287_v63 = vld [vmem:[%s1540_s7 + $0x1d8] sm:$0xff] }
  0xb4   : > { %1421 = vmatmul.msk.f32.gmra.mxu3 %vm783_vm1, %v748_v62  ;;  %v255_v62 = vld [vmem:[%s1540_s7 + $0xd8] sm:$0xff] }
  0xb5   : > { %1390 = vmatmul.msk.f32.gmra.mxu1 %vm783_vm1, %v717_v0 }
  0xb6   : > { %v627_v1 = vpop.f32.mrf.mxu2 }
  0xb7   : > { %v628_v2 = vadd.f32 %v1616_v37, %v627_v1 }
  0xb8   : > { %v534_v3 = vpop.f32.mrf.mxu0 }
  0xb9   : > { %v749_v6 = vmax.f32 %v628_v2, 0.0  ;;  %v535_v7 = vadd.f32 %v1616_v37, %v534_v3 }
  0xbb   : > { %v718_v8 = vmax.f32 %v535_v7, 0.0  ;;  %1342 = vmatmul.msk.f32.gmra.mxu0 %vm300_vm0, %v248_v4  ;;  %1374 = vmatmul.msk.f32.gmra.mxu2 %vm300_vm0, %v280_v5  ;;  %v288_v7 = vld [vmem:[%s1540_s7 + $0x1e0] sm:$0xff] }
  0xbc   : > { %1422 = vmatmul.msk.f32.gmra.mxu3 %vm783_vm1, %v749_v6  ;;  %v256_v6 = vld [vmem:[%s1540_s7 + $0xe0] sm:$0xff] }
  0xbd   : > { %1391 = vmatmul.msk.f32.gmra.mxu1 %vm783_vm1, %v718_v8 }
  0xbe   : > { %v630_v9 = vpop.f32.mrf.mxu2 }
  0xbf   : > { %v631_v10 = vadd.f32 %v1616_v37, %v630_v9 }
  0xc0   : > { %v537_v11 = vpop.f32.mrf.mxu0 }
  0xc1   : > { %v750_v14 = vmax.f32 %v631_v10, 0.0  ;;  %v538_v15 = vadd.f32 %v1616_v37, %v537_v11 }
  0xc3   : > { %v719_v16 = vmax.f32 %v538_v15, 0.0  ;;  %1343 = vmatmul.msk.f32.gmra.mxu0 %vm300_vm0, %v249_v12  ;;  %1375 = vmatmul.msk.f32.gmra.mxu2 %vm300_vm0, %v281_v13  ;;  %v289_v15 = vld [vmem:[%s1540_s7 + $0x1e8] sm:$0xff] }
  0xc4   : > { %1423 = vmatmul.msk.f32.gmra.mxu3 %vm783_vm1, %v750_v14  ;;  %v257_v14 = vld [vmem:[%s1540_s7 + $0xe8] sm:$0xff] }
  0xc5   : > { %1392 = vmatmul.msk.f32.gmra.mxu1 %vm783_vm1, %v719_v16 }
  0xc6   : > { %v633_v17 = vpop.f32.mrf.mxu2 }
  0xc7   : > { %v634_v18 = vadd.f32 %v1616_v37, %v633_v17 }
  0xc8   : > { %v540_v19 = vpop.f32.mrf.mxu0 }
  0xc9   : > { %v751_v22 = vmax.f32 %v634_v18, 0.0  ;;  %v541_v23 = vadd.f32 %v1616_v37, %v540_v19 }
  0xcb   : > { %v720_v24 = vmax.f32 %v541_v23, 0.0  ;;  %1344 = vmatmul.msk.f32.gmra.mxu0 %vm300_vm0, %v250_v20  ;;  %1376 = vmatmul.msk.f32.gmra.mxu2 %vm300_vm0, %v282_v21  ;;  %v290_v23 = vld [vmem:[%s1540_s7 + $0x1f0] sm:$0xff] }
  0xcc   : > { %1424 = vmatmul.msk.f32.gmra.mxu3 %vm783_vm1, %v751_v22  ;;  %v258_v22 = vld [vmem:[%s1540_s7 + $0xf0] sm:$0xff] }
  0xcd   : > { %1393 = vmatmul.msk.f32.gmra.mxu1 %vm783_vm1, %v720_v24 }
  0xce   : > { %v636_v25 = vpop.f32.mrf.mxu2 }
  0xcf   : > { %v637_v26 = vadd.f32 %v1616_v37, %v636_v25 }
  0xd0   : > { %v543_v27 = vpop.f32.mrf.mxu0 }
  0xd1   : > { %v752_v30 = vmax.f32 %v637_v26, 0.0  ;;  %v544_v31 = vadd.f32 %v1616_v37, %v543_v27 }
  0xd3   : > { %v721_v32 = vmax.f32 %v544_v31, 0.0  ;;  %1345 = vmatmul.msk.f32.gmra.mxu0 %vm300_vm0, %v251_v28  ;;  %1377 = vmatmul.msk.f32.gmra.mxu2 %vm300_vm0, %v283_v29  ;;  %v291_v31 = vld [vmem:[%s1540_s7 + $0x1f8] sm:$0xff] }
  0xd4   : > { %1425 = vmatmul.msk.f32.gmra.mxu3 %vm783_vm1, %v752_v30  ;;  %v259_v30 = vld [vmem:[%s1540_s7 + $0xf8] sm:$0xff] }
  0xd5   : > { %1394 = vmatmul.msk.f32.gmra.mxu1 %vm783_vm1, %v721_v32 }
  0xd6   : > { %v639_v33 = vpop.f32.mrf.mxu2 }
  0xd7   : > { %v640_v34 = vadd.f32 %v1616_v37, %v639_v33 }
  0xd8   : > { %v546_v35 = vpop.f32.mrf.mxu0 }
  0xd9   : > { %v753_v39 = vmax.f32 %v640_v34, 0.0  ;;  %v547_v40 = vadd.f32 %v1616_v37, %v546_v35 }
  0xdb   : > { %v722_v41 = vmax.f32 %v547_v40, 0.0  ;;  %1346 = vmatmul.msk.f32.gmra.mxu0 %vm300_vm0, %v252_v36  ;;  %1378 = vmatmul.msk.f32.gmra.mxu2 %vm300_vm0, %v284_v38  ;;  %v1748_v38 = vld [vmem:[%s2024_s4] ss:$0 sm:$0xff] }
  0xdc   : > { %1426 = vmatmul.msk.f32.gmra.mxu3 %vm783_vm1, %v753_v39 }
  0xdd   : > { %1395 = vmatmul.msk.f32.gmra.mxu1 %vm783_vm1, %v722_v41 }
  0xde   : > { %v642_v42 = vpop.f32.mrf.mxu2 }
  0xdf   : > { %v643_v44 = vadd.f32 %v1616_v37, %v642_v42 }
  0xe0   : > { %v549_v45 = vpop.f32.mrf.mxu0 }
  0xe1   : > { %v754_v48 = vmax.f32 %v643_v44, 0.0  ;;  %v550_v49 = vadd.f32 %v1616_v37, %v549_v45 }
  0xe3   : > { %v723_v50 = vmax.f32 %v550_v49, 0.0  ;;  %1347 = vmatmul.msk.f32.gmra.mxu0 %vm300_vm0, %v253_v46  ;;  %1379 = vmatmul.msk.f32.gmra.mxu2 %vm300_vm0, %v285_v47 }
  0xe4   : > { %1427 = vmatmul.msk.f32.gmra.mxu3 %vm783_vm1, %v754_v48 }
  0xe5   : > { %1396 = vmatmul.msk.f32.gmra.mxu1 %vm783_vm1, %v723_v50 }
  0xe6   : > { %v645_v51 = vpop.f32.mrf.mxu2 }
  0xe7   : > { %v646_v52 = vadd.f32 %v1616_v37, %v645_v51 }
  0xe8   : > { %v552_v53 = vpop.f32.mrf.mxu0 }
  0xe9   : > { %v755_v56 = vmax.f32 %v646_v52, 0.0  ;;  %v553_v57 = vadd.f32 %v1616_v37, %v552_v53 }
  0xeb   : > { %v724_v58 = vmax.f32 %v553_v57, 0.0  ;;  %1348 = vmatmul.msk.f32.gmra.mxu0 %vm300_vm0, %v254_v54  ;;  %1380 = vmatmul.msk.f32.gmra.mxu2 %vm300_vm0, %v286_v55 }
  0xec   : > { %1428 = vmatmul.msk.f32.gmra.mxu3 %vm783_vm1, %v755_v56 }
  0xed   : > { %1397 = vmatmul.msk.f32.gmra.mxu1 %vm783_vm1, %v724_v58 }
  0xee   : > { %v648_v59 = vpop.f32.mrf.mxu2 }
  0xef   : > { %v649_v60 = vadd.f32 %v1616_v37, %v648_v59 }
  0xf0   : > { %v555_v61 = vpop.f32.mrf.mxu0 }
  0xf1   : > { %v756_v0 = vmax.f32 %v649_v60, 0.0  ;;  %v556_v1 = vadd.f32 %v1616_v37, %v555_v61 }
  0xf3   : > { %v725_v2 = vmax.f32 %v556_v1, 0.0  ;;  %1349 = vmatmul.msk.f32.gmra.mxu0 %vm300_vm0, %v255_v62  ;;  %1381 = vmatmul.msk.f32.gmra.mxu2 %vm300_vm0, %v287_v63 }
  0xf4   : > { %1429 = vmatmul.msk.f32.gmra.mxu3 %vm783_vm1, %v756_v0 }
  0xf5   : > { %1398 = vmatmul.msk.f32.gmra.mxu1 %vm783_vm1, %v725_v2 }
  0xf6   : > { %v651_v3 = vpop.f32.mrf.mxu2 }
  0xf7   : > { %v652_v4 = vadd.f32 %v1616_v37, %v651_v3 }
  0xf8   : > { %v558_v5 = vpop.f32.mrf.mxu0 }
  0xf9   : > { %v757_v8 = vmax.f32 %v652_v4, 0.0  ;;  %v559_v9 = vadd.f32 %v1616_v37, %v558_v5 }
  0xfb   : > { %v726_v10 = vmax.f32 %v559_v9, 0.0  ;;  %1350 = vmatmul.msk.f32.gmra.mxu0 %vm300_vm0, %v256_v6  ;;  %1382 = vmatmul.msk.f32.gmra.mxu2 %vm300_vm0, %v288_v7 }
  0xfc   : > { %1430 = vmatmul.msk.f32.gmra.mxu3 %vm783_vm1, %v757_v8 }
  0xfd   : > { %1399 = vmatmul.msk.f32.gmra.mxu1 %vm783_vm1, %v726_v10 }
  0xfe   : > { %v654_v11 = vpop.f32.mrf.mxu2 }
  0xff   : > { %v655_v12 = vadd.f32 %v1616_v37, %v654_v11 }
 0x100   : > { %v561_v13 = vpop.f32.mrf.mxu0 }
 0x101   : > { %v758_v16 = vmax.f32 %v655_v12, 0.0  ;;  %v562_v17 = vadd.f32 %v1616_v37, %v561_v13 }
 0x103   : > { %v727_v18 = vmax.f32 %v562_v17, 0.0  ;;  %1351 = vmatmul.msk.f32.gmra.mxu0 %vm300_vm0, %v257_v14  ;;  %1383 = vmatmul.msk.f32.gmra.mxu2 %vm300_vm0, %v289_v15 }
 0x104   : > { %1431 = vmatmul.msk.f32.gmra.mxu3 %vm783_vm1, %v758_v16 }
 0x105   : > { %1400 = vmatmul.msk.f32.gmra.mxu1 %vm783_vm1, %v727_v18 }
 0x106   : > { %v657_v19 = vpop.f32.mrf.mxu2 }
 0x107   : > { %v658_v20 = vadd.f32 %v1616_v37, %v657_v19 }
 0x108   : > { %v564_v21 = vpop.f32.mrf.mxu0 }
 0x109   : > { %v759_v24 = vmax.f32 %v658_v20, 0.0  ;;  %v565_v25 = vadd.f32 %v1616_v37, %v564_v21 }
 0x10b   : > { %v728_v26 = vmax.f32 %v565_v25, 0.0  ;;  %1352 = vmatmul.msk.f32.gmra.mxu0 %vm300_vm0, %v258_v22  ;;  %1384 = vmatmul.msk.f32.gmra.mxu2 %vm300_vm0, %v290_v23 }
 0x10c   : > { %1432 = vmatmul.msk.f32.gmra.mxu3 %vm783_vm1, %v759_v24 }
 0x10d   : > { %1401 = vmatmul.msk.f32.gmra.mxu1 %vm783_vm1, %v728_v26 }
 0x10e   : > { %v660_v27 = vpop.f32.mrf.mxu2 }
 0x10f   : > { %v661_v28 = vadd.f32 %v1616_v37, %v660_v27 }
 0x110   : > { %v567_v29 = vpop.f32.mrf.mxu0 }
 0x111   : > { %v760_v32 = vmax.f32 %v661_v28, 0.0  ;;  %v568_v33 = vadd.f32 %v1616_v37, %v567_v29 }
 0x113   : > { %v729_v34 = vmax.f32 %v568_v33, 0.0  ;;  %1353 = vmatmul.msk.f32.gmra.mxu0 %vm300_vm0, %v259_v30  ;;  %1385 = vmatmul.msk.f32.gmra.mxu2 %vm300_vm0, %v291_v31 }
 0x114   : > { %1433 = vmatmul.msk.f32.gmra.mxu3 %vm783_vm1, %v760_v32 }
 0x115   : > { %1402 = vmatmul.msk.f32.gmra.mxu1 %vm783_vm1, %v729_v34 }
 0x116   : > { %v663_v35 = vpop.f32.mrf.mxu2 }
 0x117   : > { %v664_v36 = vadd.f32 %v1616_v37, %v663_v35 }
 0x118   : > { %v570_v39 = vpop.f32.mrf.mxu0 }
 0x119   : > { %v761_v40 = vmax.f32 %v664_v36, 0.0  ;;  %v571_v41 = vadd.f32 %v1616_v37, %v570_v39 }
 0x11a   : > { %v996_v42 = vpop.f32.mrf.mxu1 }
 0x11b   : > { %v730_v44 = vmax.f32 %v571_v41, 0.0  ;;  %v997_v45 = vadd.f32 %v1748_v38, %v996_v42 }
 0x11c   : > { %1434 = vmatmul.msk.f32.gmra.mxu3 %vm783_vm1, %v761_v40 }
 0x11d   : > { %1189 = vst.msk [vmem:[%s1756_s16] sm:$0xff] %vm1188_vm2, %v997_v45  ;;  %1403 = vmatmul.msk.f32.gmra.mxu1 %vm783_vm1, %v730_v44 }
 0x11e   : > { %v666_v46 = vpop.f32.mrf.mxu2 }
 0x11f   : > { %v667_v47 = vadd.f32 %v1616_v37, %v666_v46 }
 0x120   : > { %v573_v48 = vpop.f32.mrf.mxu0 }
 0x121   : > { %v762_v49 = vmax.f32 %v667_v47, 0.0  ;;  %v574_v50 = vadd.f32 %v1616_v37, %v573_v48 }
 0x122   : > { %v999_v51 = vpop.f32.mrf.mxu1 }
 0x123   : > { %v731_v52 = vmax.f32 %v574_v50, 0.0  ;;  %v1000_v53 = vadd.f32 %v1748_v38, %v999_v51 }
 0x124   : > { %1435 = vmatmul.msk.f32.gmra.mxu3 %vm783_vm1, %v762_v49 }
 0x125   : > { %1190 = vst.msk [vmem:[%s1756_s16 + $0x8] sm:$0xff] %vm1188_vm2, %v1000_v53  ;;  %1404 = vmatmul.msk.f32.gmra.mxu1 %vm783_vm1, %v731_v52 }
 0x126   : > { %v669_v54 = vpop.f32.mrf.mxu2 }
 0x127   : > { %v670_v55 = vadd.f32 %v1616_v37, %v669_v54 }
 0x128   : > { %v576_v56 = vpop.f32.mrf.mxu0 }
 0x129   : > { %v763_v57 = vmax.f32 %v670_v55, 0.0  ;;  %v577_v58 = vadd.f32 %v1616_v37, %v576_v56 }
 0x12a   : > { %v1002_v59 = vpop.f32.mrf.mxu1 }
 0x12b   : > { %v732_v60 = vmax.f32 %v577_v58, 0.0  ;;  %v1003_v61 = vadd.f32 %v1748_v38, %v1002_v59 }
 0x12c   : > { %1436 = vmatmul.msk.f32.gmra.mxu3 %vm783_vm1, %v763_v57 }
 0x12d   : > { %1191 = vst.msk [vmem:[%s1756_s16 + $0x10] sm:$0xff] %vm1188_vm2, %v1003_v61  ;;  %1405 = vmatmul.msk.f32.gmra.mxu1 %vm783_vm1, %v732_v60 }
 0x12e   : > { %v672_v62 = vpop.f32.mrf.mxu2 }
 0x12f   : > { %v673_v63 = vadd.f32 %v1616_v37, %v672_v62  ;;  %v1095_v0 = vpop.f32.mrf.mxu3 }
 0x130   : > { %v1096_v1 = vadd.f32 %v1748_v38, %v1095_v0  ;;  %v579_v2 = vpop.f32.mrf.mxu0 }
 0x131   : > { %v764_v3 = vmax.f32 %v673_v63, 0.0  ;;  %v580_v4 = vadd.f32 %v1616_v37, %v579_v2 }
 0x132   : > { %1222 = vst.msk [vmem:[%s1756_s16 + $0x108] sm:$0xff] %vm1188_vm2, %v1096_v1  ;;  %v1005_v5 = vpop.f32.mrf.mxu1 }
 0x133   : > { %v733_v6 = vmax.f32 %v580_v4, 0.0  ;;  %v1006_v7 = vadd.f32 %v1748_v38, %v1005_v5 }
 0x134   : > { %1437 = vmatmul.msk.f32.gmra.mxu3 %vm783_vm1, %v764_v3 }
 0x135   : > { %1192 = vst.msk [vmem:[%s1756_s16 + $0x18] sm:$0xff] %vm1188_vm2, %v1006_v7  ;;  %1406 = vmatmul.msk.f32.gmra.mxu1 %vm783_vm1, %v733_v6 }
 0x136   : > { %v675_v8 = vpop.f32.mrf.mxu2 }
 0x137   : > { %v676_v9 = vadd.f32 %v1616_v37, %v675_v8  ;;  %v1098_v10 = vpop.f32.mrf.mxu3 }
 0x138   : > { %v1099_v11 = vadd.f32 %v1748_v38, %v1098_v10  ;;  %v582_v12 = vpop.f32.mrf.mxu0 }
 0x139   : > { %v765_v13 = vmax.f32 %v676_v9, 0.0  ;;  %v583_v14 = vadd.f32 %v1616_v37, %v582_v12 }
 0x13a   : > { %1223 = vst.msk [vmem:[%s1756_s16 + $0x110] sm:$0xff] %vm1188_vm2, %v1099_v11  ;;  %v1008_v15 = vpop.f32.mrf.mxu1 }
 0x13b   : > { %v734_v16 = vmax.f32 %v583_v14, 0.0  ;;  %v1009_v17 = vadd.f32 %v1748_v38, %v1008_v15 }
 0x13c   : > { %1438 = vmatmul.msk.f32.gmra.mxu3 %vm783_vm1, %v765_v13 }
 0x13d   : > { %1193 = vst.msk [vmem:[%s1756_s16 + $0x20] sm:$0xff] %vm1188_vm2, %v1009_v17  ;;  %1407 = vmatmul.msk.f32.gmra.mxu1 %vm783_vm1, %v734_v16 }
 0x13e   : > { %v678_v18 = vpop.f32.mrf.mxu2 }
 0x13f   : > { %v679_v19 = vadd.f32 %v1616_v37, %v678_v18  ;;  %v1101_v20 = vpop.f32.mrf.mxu3 }
 0x140   : > { %v1102_v21 = vadd.f32 %v1748_v38, %v1101_v20  ;;  %v585_v22 = vpop.f32.mrf.mxu0 }
 0x141   : > { %v766_v23 = vmax.f32 %v679_v19, 0.0  ;;  %v586_v24 = vadd.f32 %v1616_v37, %v585_v22 }
 0x142   : > { %1224 = vst.msk [vmem:[%s1756_s16 + $0x118] sm:$0xff] %vm1188_vm2, %v1102_v21  ;;  %v1011_v25 = vpop.f32.mrf.mxu1 }
 0x143   : > { %v735_v26 = vmax.f32 %v586_v24, 0.0  ;;  %v1012_v27 = vadd.f32 %v1748_v38, %v1011_v25 }
 0x144   : > { %1439 = vmatmul.msk.f32.gmra.mxu3 %vm783_vm1, %v766_v23 }
 0x145   : > { %1194 = vst.msk [vmem:[%s1756_s16 + $0x28] sm:$0xff] %vm1188_vm2, %v1012_v27  ;;  %1408 = vmatmul.msk.f32.gmra.mxu1 %vm783_vm1, %v735_v26 }
 0x146   : > { %v681_v28 = vpop.f32.mrf.mxu2 }
 0x147   : > { %v682_v29 = vadd.f32 %v1616_v37, %v681_v28  ;;  %v1104_v30 = vpop.f32.mrf.mxu3 }
 0x148   : > { %v1105_v31 = vadd.f32 %v1748_v38, %v1104_v30  ;;  %v588_v32 = vpop.f32.mrf.mxu0 }
 0x149   : > { %v767_v33 = vmax.f32 %v682_v29, 0.0  ;;  %v589_v34 = vadd.f32 %v1616_v37, %v588_v32 }
 0x14a   : > { %1225 = vst.msk [vmem:[%s1756_s16 + $0x120] sm:$0xff] %vm1188_vm2, %v1105_v31  ;;  %v1014_v35 = vpop.f32.mrf.mxu1 }
 0x14b   : > { %v736_v36 = vmax.f32 %v589_v34, 0.0  ;;  %v1015_v39 = vadd.f32 %v1748_v38, %v1014_v35 }
 0x14c   : > { %1440 = vmatmul.msk.f32.gmra.mxu3 %vm783_vm1, %v767_v33 }
 0x14d   : > { %1195 = vst.msk [vmem:[%s1756_s16 + $0x30] sm:$0xff] %vm1188_vm2, %v1015_v39  ;;  %1409 = vmatmul.msk.f32.gmra.mxu1 %vm783_vm1, %v736_v36 }
 0x14e   : > { %v684_v40 = vpop.f32.mrf.mxu2 }
 0x14f   : > { %v685_v41 = vadd.f32 %v1616_v37, %v684_v40  ;;  %v1107_v42 = vpop.f32.mrf.mxu3 }
 0x150   : > { %v1108_v44 = vadd.f32 %v1748_v38, %v1107_v42  ;;  %v591_v45 = vpop.f32.mrf.mxu0 }
 0x151   : > { %v768_v46 = vmax.f32 %v685_v41, 0.0  ;;  %v592_v47 = vadd.f32 %v1616_v37, %v591_v45 }
 0x152   : > { %1226 = vst.msk [vmem:[%s1756_s16 + $0x128] sm:$0xff] %vm1188_vm2, %v1108_v44  ;;  %v1017_v48 = vpop.f32.mrf.mxu1 }
 0x153   : > { %v737_v49 = vmax.f32 %v592_v47, 0.0  ;;  %v1018_v50 = vadd.f32 %v1748_v38, %v1017_v48 }
 0x154   : > { %1441 = vmatmul.msk.f32.gmra.mxu3 %vm783_vm1, %v768_v46 }
 0x155   : > { %1196 = vst.msk [vmem:[%s1756_s16 + $0x38] sm:$0xff] %vm1188_vm2, %v1018_v50  ;;  %1410 = vmatmul.msk.f32.gmra.mxu1 %vm783_vm1, %v737_v49 }
 0x156   : > { %v687_v51 = vpop.f32.mrf.mxu2 }
 0x157   : > { %v688_v52 = vadd.f32 %v1616_v37, %v687_v51  ;;  %v1110_v53 = vpop.f32.mrf.mxu3 }
 0x158   : > { %v1111_v54 = vadd.f32 %v1748_v38, %v1110_v53  ;;  %v594_v55 = vpop.f32.mrf.mxu0 }
 0x159   : > { %v769_v56 = vmax.f32 %v688_v52, 0.0  ;;  %v595_v57 = vadd.f32 %v1616_v37, %v594_v55 }
 0x15a   : > { %1227 = vst.msk [vmem:[%s1756_s16 + $0x130] sm:$0xff] %vm1188_vm2, %v1111_v54  ;;  %v1020_v58 = vpop.f32.mrf.mxu1 }
 0x15b   : > { %v738_v59 = vmax.f32 %v595_v57, 0.0  ;;  %v1021_v60 = vadd.f32 %v1748_v38, %v1020_v58 }
 0x15c   : > { %1442 = vmatmul.msk.f32.gmra.mxu3 %vm783_vm1, %v769_v56 }
 0x15d   : > { %1197 = vst.msk [vmem:[%s1756_s16 + $0x40] sm:$0xff] %vm1188_vm2, %v1021_v60  ;;  %1411 = vmatmul.msk.f32.gmra.mxu1 %vm783_vm1, %v738_v59 }
 0x15e   : > { %v690_v61 = vpop.f32.mrf.mxu2 }
 0x15f   : > { %v691_v62 = vadd.f32 %v1616_v37, %v690_v61  ;;  %v1113_v63 = vpop.f32.mrf.mxu3 }
 0x160   : > { %v1114_v0 = vadd.f32 %v1748_v38, %v1113_v63  ;;  %v597_v1 = vpop.f32.mrf.mxu0 }
 0x161   : > { %v770_v2 = vmax.f32 %v691_v62, 0.0  ;;  %v598_v3 = vadd.f32 %v1616_v37, %v597_v1 }
 0x162   : > { %1228 = vst.msk [vmem:[%s1756_s16 + $0x138] sm:$0xff] %vm1188_vm2, %v1114_v0  ;;  %v1023_v4 = vpop.f32.mrf.mxu1 }
 0x163   : > { %v739_v5 = vmax.f32 %v598_v3, 0.0  ;;  %v1024_v6 = vadd.f32 %v1748_v38, %v1023_v4 }
 0x164   : > { %1443 = vmatmul.msk.f32.gmra.mxu3 %vm783_vm1, %v770_v2 }
 0x165   : > { %1198 = vst.msk [vmem:[%s1756_s16 + $0x48] sm:$0xff] %vm1188_vm2, %v1024_v6  ;;  %1412 = vmatmul.msk.f32.gmra.mxu1 %vm783_vm1, %v739_v5 }
 0x166   : > { %v693_v7 = vpop.f32.mrf.mxu2 }
 0x167   : > { %v694_v8 = vadd.f32 %v1616_v37, %v693_v7  ;;  %v1116_v9 = vpop.f32.mrf.mxu3  ;;  %v619_v7 = vadd.f32 %v1616_v37, %v1624_v43 }
 0x168   : > { %v1117_v10 = vadd.f32 %v1748_v38, %v1116_v9  ;;  %v600_v11 = vpop.f32.mrf.mxu0 }
 0x169   : > { %v771_v12 = vmax.f32 %v694_v8, 0.0  ;;  %v601_v13 = vadd.f32 %v1616_v37, %v600_v11 }
 0x16a   : > { %1229 = vst.msk [vmem:[%s1756_s16 + $0x140] sm:$0xff] %vm1188_vm2, %v1117_v10  ;;  %v1026_v14 = vpop.f32.mrf.mxu1 }
 0x16b   : > { %v740_v15 = vmax.f32 %v601_v13, 0.0  ;;  %v1027_v16 = vadd.f32 %v1748_v38, %v1026_v14  ;;  %v746_v13 = vmax.f32 %v619_v7, 0.0 }
 0x16c   : > { %1444 = vmatmul.msk.f32.gmra.mxu3 %vm783_vm1, %v771_v12 }
 0x16d   : > { %1199 = vst.msk [vmem:[%s1756_s16 + $0x50] sm:$0xff] %vm1188_vm2, %v1027_v16  ;;  %1413 = vmatmul.msk.f32.gmra.mxu1 %vm783_vm1, %v740_v15 }
 0x16e   : > { %v696_v17 = vpop.f32.mrf.mxu2 }
 0x16f   : > { %v697_v18 = vadd.f32 %v1616_v37, %v696_v17  ;;  %v1119_v19 = vpop.f32.mrf.mxu3 }
 0x170   : > { %v1120_v20 = vadd.f32 %v1748_v38, %v1119_v19  ;;  %v603_v21 = vpop.f32.mrf.mxu0 }
 0x171   : > { %v772_v22 = vmax.f32 %v697_v18, 0.0  ;;  %v604_v23 = vadd.f32 %v1616_v37, %v603_v21 }
 0x172   : > { %1230 = vst.msk [vmem:[%s1756_s16 + $0x148] sm:$0xff] %vm1188_vm2, %v1120_v20  ;;  %v1029_v24 = vpop.f32.mrf.mxu1 }
 0x173   : > { %v741_v25 = vmax.f32 %v604_v23, 0.0  ;;  %v1030_v26 = vadd.f32 %v1748_v38, %v1029_v24 }
 0x174   : > { %1445 = vmatmul.msk.f32.gmra.mxu3 %vm783_vm1, %v772_v22 }
 0x175   : > { %1200 = vst.msk [vmem:[%s1756_s16 + $0x58] sm:$0xff] %vm1188_vm2, %v1030_v26  ;;  %1414 = vmatmul.msk.f32.gmra.mxu1 %vm783_vm1, %v741_v25 }
 0x176   : > { %v699_v27 = vpop.f32.mrf.mxu2 }
 0x177   : > { %v700_v28 = vadd.f32 %v1616_v37, %v699_v27  ;;  %v1122_v29 = vpop.f32.mrf.mxu3 }
 0x178   : > { %v1123_v30 = vadd.f32 %v1748_v38, %v1122_v29  ;;  %v606_v31 = vpop.f32.mrf.mxu0 }
 0x179   : > { %v773_v32 = vmax.f32 %v700_v28, 0.0  ;;  %v607_v33 = vadd.f32 %v1616_v37, %v606_v31 }
 0x17a   : > { %1231 = vst.msk [vmem:[%s1756_s16 + $0x150] sm:$0xff] %vm1188_vm2, %v1123_v30  ;;  %v1032_v34 = vpop.f32.mrf.mxu1 }
 0x17b   : > { %v742_v35 = vmax.f32 %v607_v33, 0.0  ;;  %v1033_v36 = vadd.f32 %v1748_v38, %v1032_v34 }
 0x17c   : > { %1446 = vmatmul.msk.f32.gmra.mxu3 %vm783_vm1, %v773_v32 }
 0x17d   : > { %1201 = vst.msk [vmem:[%s1756_s16 + $0x60] sm:$0xff] %vm1188_vm2, %v1033_v36  ;;  %1415 = vmatmul.msk.f32.gmra.mxu1 %vm783_vm1, %v742_v35 }
 0x17e   : > { %v702_v39 = vpop.f32.mrf.mxu2 }
 0x17f   : > { %v703_v40 = vadd.f32 %v1616_v37, %v702_v39  ;;  %v1125_v41 = vpop.f32.mrf.mxu3 }
 0x180   : > { %v1126_v42 = vadd.f32 %v1748_v38, %v1125_v41  ;;  %v609_v44 = vpop.f32.mrf.mxu0 }
 0x181   : > { %v774_v45 = vmax.f32 %v703_v40, 0.0  ;;  %v610_v46 = vadd.f32 %v1616_v37, %v609_v44 }
 0x182   : > { %1232 = vst.msk [vmem:[%s1756_s16 + $0x158] sm:$0xff] %vm1188_vm2, %v1126_v42  ;;  %v1035_v47 = vpop.f32.mrf.mxu1 }
 0x183   : > { %v743_v48 = vmax.f32 %v610_v46, 0.0  ;;  %v1036_v49 = vadd.f32 %v1748_v38, %v1035_v47 }
 0x184   : > { %1447 = vmatmul.msk.f32.gmra.mxu3 %vm783_vm1, %v774_v45 }
 0x185   : > { %1202 = vst.msk [vmem:[%s1756_s16 + $0x68] sm:$0xff] %vm1188_vm2, %v1036_v49  ;;  %1416 = vmatmul.msk.f32.gmra.mxu1 %vm783_vm1, %v743_v48 }
 0x186   : > { %v705_v50 = vpop.f32.mrf.mxu2 }
 0x187   : > { %v706_v51 = vadd.f32 %v1616_v37, %v705_v50  ;;  %v1128_v52 = vpop.f32.mrf.mxu3 }
 0x188   : > { %v1129_v53 = vadd.f32 %v1748_v38, %v1128_v52  ;;  %v612_v54 = vpop.f32.mrf.mxu0 }
 0x189   : > { %v775_v55 = vmax.f32 %v706_v51, 0.0  ;;  %v613_v56 = vadd.f32 %v1616_v37, %v612_v54 }
 0x18a   : > { %1233 = vst.msk [vmem:[%s1756_s16 + $0x160] sm:$0xff] %vm1188_vm2, %v1129_v53  ;;  %v1038_v57 = vpop.f32.mrf.mxu1 }
 0x18b   : > { %v744_v58 = vmax.f32 %v613_v56, 0.0  ;;  %v1039_v59 = vadd.f32 %v1748_v38, %v1038_v57 }
 0x18c   : > { %1448 = vmatmul.msk.f32.gmra.mxu3 %vm783_vm1, %v775_v55 }
 0x18d   : > { %1203 = vst.msk [vmem:[%s1756_s16 + $0x70] sm:$0xff] %vm1188_vm2, %v1039_v59  ;;  %1417 = vmatmul.msk.f32.gmra.mxu1 %vm783_vm1, %v744_v58 }
 0x18e   : > { %v708_v60 = vpop.f32.mrf.mxu2 }
 0x18f   : > { %v709_v61 = vadd.f32 %v1616_v37, %v708_v60  ;;  %v1131_v62 = vpop.f32.mrf.mxu3 }
 0x190   : > { %v1132_v63 = vadd.f32 %v1748_v38, %v1131_v62  ;;  %v615_v0 = vpop.f32.mrf.mxu0 }
 0x191   : > { %v776_v1 = vmax.f32 %v709_v61, 0.0  ;;  %v616_v2 = vadd.f32 %v1616_v37, %v615_v0 }
 0x192   : > { %1234 = vst.msk [vmem:[%s1756_s16 + $0x168] sm:$0xff] %vm1188_vm2, %v1132_v63  ;;  %v1041_v3 = vpop.f32.mrf.mxu1 }
 0x193   : > { %v745_v4 = vmax.f32 %v616_v2, 0.0  ;;  %v1042_v5 = vadd.f32 %v1748_v38, %v1041_v3 }
 0x194   : > { %1449 = vmatmul.msk.f32.gmra.mxu3 %vm783_vm1, %v776_v1 }
 0x195   : > { %1204 = vst.msk [vmem:[%s1756_s16 + $0x78] sm:$0xff] %vm1188_vm2, %v1042_v5  ;;  %1418 = vmatmul.msk.f32.gmra.mxu1 %vm783_vm1, %v745_v4 }
 0x196   : > { %v711_v6 = vpop.f32.mrf.mxu2 }
 0x197   : > { %v712_v8 = vadd.f32 %v1616_v37, %v711_v6  ;;  %v1134_v9 = vpop.f32.mrf.mxu3 }
 0x198   : > { %v1135_v10 = vadd.f32 %v1748_v38, %v1134_v9 }
 0x199   : > { %v777_v11 = vmax.f32 %v712_v8, 0.0 }
 0x19a   : > { %1235 = vst.msk [vmem:[%s1756_s16 + $0x170] sm:$0xff] %vm1188_vm2, %v1135_v10  ;;  %v1044_v12 = vpop.f32.mrf.mxu1 }
 0x19b   : > { %v1045_v14 = vadd.f32 %v1748_v38, %v1044_v12 }
 0x19c   : > { %1450 = vmatmul.msk.f32.gmra.mxu3 %vm783_vm1, %v777_v11 }
 0x19d   : > { %1205 = vst.msk [vmem:[%s1756_s16 + $0x80] sm:$0xff] %vm1188_vm2, %v1045_v14  ;;  %1419 = vmatmul.msk.f32.gmra.mxu1 %vm783_vm1, %v746_v13 }
 0x19f   : > { %v1137_v37 = vpop.f32.mrf.mxu3 }
 0x1a0   : > { %v1138_v43 = vadd.f32 %v1748_v38, %v1137_v37 }
 0x1a2   : > { %1236 = vst.msk [vmem:[%s1756_s16 + $0x178] sm:$0xff] %vm1188_vm2, %v1138_v43  ;;  %v1047_v15 = vpop.f32.mrf.mxu1 }
 0x1a3   : > { %v1048_v16 = vadd.f32 %v1748_v38, %v1047_v15 }
 0x1a5   : > { %1206 = vst.msk [vmem:[%s1756_s16 + $0x88] sm:$0xff] %vm1188_vm2, %v1048_v16 }
 0x1a7   : > { %v1140_v17 = vpop.f32.mrf.mxu3 }
 0x1a8   : > { %v1141_v18 = vadd.f32 %v1748_v38, %v1140_v17 }
 0x1aa   : > { %1237 = vst.msk [vmem:[%s1756_s16 + $0x180] sm:$0xff] %vm1188_vm2, %v1141_v18  ;;  %v1050_v19 = vpop.f32.mrf.mxu1 }
 0x1ab   : > { %v1051_v20 = vadd.f32 %v1748_v38, %v1050_v19 }
 0x1ad   : > { %1207 = vst.msk [vmem:[%s1756_s16 + $0x90] sm:$0xff] %vm1188_vm2, %v1051_v20 }
 0x1af   : > { %v1143_v21 = vpop.f32.mrf.mxu3 }
 0x1b0   : > { %v1144_v22 = vadd.f32 %v1748_v38, %v1143_v21 }
 0x1b2   : > { %1238 = vst.msk [vmem:[%s1756_s16 + $0x188] sm:$0xff] %vm1188_vm2, %v1144_v22  ;;  %v1053_v23 = vpop.f32.mrf.mxu1 }
 0x1b3   : > { %v1054_v24 = vadd.f32 %v1748_v38, %v1053_v23 }
 0x1b5   : > { %1208 = vst.msk [vmem:[%s1756_s16 + $0x98] sm:$0xff] %vm1188_vm2, %v1054_v24 }
 0x1b7   : > { %v1146_v25 = vpop.f32.mrf.mxu3 }
 0x1b8   : > { %v1147_v26 = vadd.f32 %v1748_v38, %v1146_v25 }
 0x1ba   : > { %1239 = vst.msk [vmem:[%s1756_s16 + $0x190] sm:$0xff] %vm1188_vm2, %v1147_v26  ;;  %v1056_v27 = vpop.f32.mrf.mxu1 }
 0x1bb   : > { %v1057_v28 = vadd.f32 %v1748_v38, %v1056_v27 }
 0x1bd   : > { %1209 = vst.msk [vmem:[%s1756_s16 + $0xa0] sm:$0xff] %vm1188_vm2, %v1057_v28 }
 0x1bf   : > { %v1149_v29 = vpop.f32.mrf.mxu3 }
 0x1c0   : > { %v1150_v30 = vadd.f32 %v1748_v38, %v1149_v29 }
 0x1c2   : > { %1240 = vst.msk [vmem:[%s1756_s16 + $0x198] sm:$0xff] %vm1188_vm2, %v1150_v30  ;;  %v1059_v31 = vpop.f32.mrf.mxu1 }
 0x1c3   : > { %v1060_v32 = vadd.f32 %v1748_v38, %v1059_v31 }
 0x1c5   : > { %1210 = vst.msk [vmem:[%s1756_s16 + $0xa8] sm:$0xff] %vm1188_vm2, %v1060_v32 }
 0x1c7   : > { %v1152_v33 = vpop.f32.mrf.mxu3 }
 0x1c8   : > { %v1153_v34 = vadd.f32 %v1748_v38, %v1152_v33 }
 0x1ca   : > { %1241 = vst.msk [vmem:[%s1756_s16 + $0x1a0] sm:$0xff] %vm1188_vm2, %v1153_v34  ;;  %v1062_v35 = vpop.f32.mrf.mxu1 }
 0x1cb   : > { %v1063_v36 = vadd.f32 %v1748_v38, %v1062_v35 }
 0x1cd   : > { %1211 = vst.msk [vmem:[%s1756_s16 + $0xb0] sm:$0xff] %vm1188_vm2, %v1063_v36 }
 0x1cf   : > { %v1155_v39 = vpop.f32.mrf.mxu3 }
 0x1d0   : > { %v1156_v40 = vadd.f32 %v1748_v38, %v1155_v39 }
 0x1d2   : > { %1242 = vst.msk [vmem:[%s1756_s16 + $0x1a8] sm:$0xff] %vm1188_vm2, %v1156_v40  ;;  %v1065_v41 = vpop.f32.mrf.mxu1 }
 0x1d3   : > { %v1066_v42 = vadd.f32 %v1748_v38, %v1065_v41 }
 0x1d5   : > { %1212 = vst.msk [vmem:[%s1756_s16 + $0xb8] sm:$0xff] %vm1188_vm2, %v1066_v42 }
 0x1d7   : > { %v1158_v44 = vpop.f32.mrf.mxu3 }
 0x1d8   : > { %v1159_v45 = vadd.f32 %v1748_v38, %v1158_v44 }
 0x1da   : > { %1243 = vst.msk [vmem:[%s1756_s16 + $0x1b0] sm:$0xff] %vm1188_vm2, %v1159_v45  ;;  %v1068_v46 = vpop.f32.mrf.mxu1 }
 0x1db   : > { %v1069_v47 = vadd.f32 %v1748_v38, %v1068_v46 }
 0x1dd   : > { %1213 = vst.msk [vmem:[%s1756_s16 + $0xc0] sm:$0xff] %vm1188_vm2, %v1069_v47 }
 0x1df   : > { %v1161_v48 = vpop.f32.mrf.mxu3 }
 0x1e0   : > { %v1162_v49 = vadd.f32 %v1748_v38, %v1161_v48 }
 0x1e2   : > { %1244 = vst.msk [vmem:[%s1756_s16 + $0x1b8] sm:$0xff] %vm1188_vm2, %v1162_v49  ;;  %v1071_v50 = vpop.f32.mrf.mxu1 }
 0x1e3   : > { %v1072_v51 = vadd.f32 %v1748_v38, %v1071_v50 }
 0x1e5   : > { %1214 = vst.msk [vmem:[%s1756_s16 + $0xc8] sm:$0xff] %vm1188_vm2, %v1072_v51 }
 0x1e7   : > { %v1164_v52 = vpop.f32.mrf.mxu3 }
 0x1e8   : > { %v1165_v53 = vadd.f32 %v1748_v38, %v1164_v52 }
 0x1ea   : > { %1245 = vst.msk [vmem:[%s1756_s16 + $0x1c0] sm:$0xff] %vm1188_vm2, %v1165_v53  ;;  %v1074_v54 = vpop.f32.mrf.mxu1 }
 0x1eb   : > { %v1075_v55 = vadd.f32 %v1748_v38, %v1074_v54 }
 0x1ed   : > { %1215 = vst.msk [vmem:[%s1756_s16 + $0xd0] sm:$0xff] %vm1188_vm2, %v1075_v55 }
 0x1ef   : > { %v1167_v56 = vpop.f32.mrf.mxu3 }
 0x1f0   : > { %v1168_v57 = vadd.f32 %v1748_v38, %v1167_v56 }
 0x1f2   : > { %1246 = vst.msk [vmem:[%s1756_s16 + $0x1c8] sm:$0xff] %vm1188_vm2, %v1168_v57  ;;  %v1077_v58 = vpop.f32.mrf.mxu1 }
 0x1f3   : > { %v1078_v59 = vadd.f32 %v1748_v38, %v1077_v58 }
 0x1f5   : > { %1216 = vst.msk [vmem:[%s1756_s16 + $0xd8] sm:$0xff] %vm1188_vm2, %v1078_v59 }
 0x1f7   : > { %v1170_v60 = vpop.f32.mrf.mxu3 }
 0x1f8   : > { %v1171_v61 = vadd.f32 %v1748_v38, %v1170_v60 }
 0x1fa   : > { %1247 = vst.msk [vmem:[%s1756_s16 + $0x1d0] sm:$0xff] %vm1188_vm2, %v1171_v61  ;;  %v1080_v62 = vpop.f32.mrf.mxu1 }
 0x1fb   : > { %v1081_v63 = vadd.f32 %v1748_v38, %v1080_v62 }
 0x1fd   : > { %1217 = vst.msk [vmem:[%s1756_s16 + $0xe0] sm:$0xff] %vm1188_vm2, %v1081_v63 }
 0x1ff   : > { %v1173_v0 = vpop.f32.mrf.mxu3 }
 0x200   : > { %v1174_v1 = vadd.f32 %v1748_v38, %v1173_v0 }
 0x202   : > { %1248 = vst.msk [vmem:[%s1756_s16 + $0x1d8] sm:$0xff] %vm1188_vm2, %v1174_v1  ;;  %v1083_v2 = vpop.f32.mrf.mxu1 }
 0x203   : > { %v1084_v3 = vadd.f32 %v1748_v38, %v1083_v2 }
 0x205   : > { %1218 = vst.msk [vmem:[%s1756_s16 + $0xe8] sm:$0xff] %vm1188_vm2, %v1084_v3 }
 0x207   : > { %v1176_v4 = vpop.f32.mrf.mxu3 }
 0x208   : > { %v1177_v5 = vadd.f32 %v1748_v38, %v1176_v4 }
 0x20a   : > { %1249 = vst.msk [vmem:[%s1756_s16 + $0x1e0] sm:$0xff] %vm1188_vm2, %v1177_v5  ;;  %v1086_v6 = vpop.f32.mrf.mxu1 }
 0x20b   : > { %v1087_v7 = vadd.f32 %v1748_v38, %v1086_v6 }
 0x20d   : > { %1219 = vst.msk [vmem:[%s1756_s16 + $0xf0] sm:$0xff] %vm1188_vm2, %v1087_v7 }
 0x20f   : > { %v1179_v8 = vpop.f32.mrf.mxu3 }
 0x210   : > { %v1180_v9 = vadd.f32 %v1748_v38, %v1179_v8 }
 0x212   : > { %1250 = vst.msk [vmem:[%s1756_s16 + $0x1e8] sm:$0xff] %vm1188_vm2, %v1180_v9  ;;  %v1089_v10 = vpop.f32.mrf.mxu1 }
 0x213   : > { %v1090_v11 = vadd.f32 %v1748_v38, %v1089_v10 }
 0x215   : > { %1220 = vst.msk [vmem:[%s1756_s16 + $0xf8] sm:$0xff] %vm1188_vm2, %v1090_v11 }
 0x217   : > { %v1182_v12 = vpop.f32.mrf.mxu3 }
 0x218   : > { %v1183_v13 = vadd.f32 %v1748_v38, %v1182_v12 }
 0x21a   : > { %1251 = vst.msk [vmem:[%s1756_s16 + $0x1f0] sm:$0xff] %vm1188_vm2, %v1183_v13  ;;  %v1092_v14 = vpop.f32.mrf.mxu1 }
 0x21b   : > { %v1093_v37 = vadd.f32 %v1748_v38, %v1092_v14 }
 0x21d   : > { %1221 = vst.msk [vmem:[%s1756_s16 + $0x100] sm:$0xff] %vm1188_vm2, %v1093_v37 }
 0x21f   : > { %v1185_v43 = vpop.f32.mrf.mxu3 }
 0x220   : > { %v1186_v15 = vadd.f32 %v1748_v38, %v1185_v43 }
 0x222   : > { %1252 = vst.msk [vmem:[%s1756_s16 + $0x1f8] sm:$0xff] %vm1188_vm2, %v1186_v15 }
 0x223 PF: > { %s15_s18 = sadd.s32 1, %s1474_s18  }
 0x224   : > { %p12_p4 = scmp.ge.s32.totalorder %s15_s18, 4  }
 0x226   :  { %14 = sbr.rel (!%p12_p4) target bundleno = 1 (0x1), region = 70 }

</bundles_post_ra>
